<compile_context>
chip_gen: v7x
topology: tpu7x:2x2x1
jax: 0.10.0
libtpu: 0.0.40
codegen_flags: <defaults>
</compile_context>

<pallas_src>
import jax
import jax.numpy as jnp
import numpy as np
from jax.experimental import pallas as pl
from jax.experimental.pallas import tpu as pltpu


def _make_self_attn_kernel(compute_dtype):
    cd = compute_dtype

    def kernel(xq_ref, xk_ref, xres_ref, m_ref, wrow_ref, wv_ref, bv_ref,
               gamma_ref, out_ref, att_ref):
        # xq_ref:   (tq, C)  compute_dtype  query tokens (token-major)
        # xk_ref:   (C, N)   compute_dtype  all tokens, channel-major (keys/values source)
        # xres_ref: (C, tq)  f32            residual slice (channel-major == NCHW-flat)
        # m_ref:    (C, C)   compute_dtype  Wq^T Wk (bilinear fold)
        # wrow_ref: (1, C)   f32            Wk^T bq (the only bias term softmax keeps)
        # wv_ref:   (C, C)   compute_dtype  Wv (used channel-major, un-transposed)
        # bv_ref:   (C, 1)   f32
        # gamma_ref: (1,)    f32 in SMEM
        xq = xq_ref[...]
        xk = xk_ref[...]

        # Query-side bilinear projection: A = Xq (Wq^T Wk) + 1 (Wk^T bq)^T   (tq, C)
        a_q = jnp.dot(xq, m_ref[...], preferred_element_type=jnp.float32) + wrow_ref[...]

        # energy = A @ Xk  — channel-major RHS makes this a plain (tq,C)x(C,N)
        # MXU matmul with K = C (no thin Cq contraction, no lane slicing).
        energy = jnp.dot(a_q.astype(cd), xk,
                         preferred_element_type=jnp.float32)              # (tq, N)

        # Exact softmax over keys in f32. Exact reciprocal so the *returned*
        # attention rows sum to 1 (only tq scalars to divide — negligible).
        e = energy - jnp.max(energy, axis=-1, keepdims=True)
        p = jnp.exp(e)
        inv = 1.0 / jnp.sum(p, axis=-1, keepdims=True)
        att = p * inv                                                      # (tq, N) f32

        # V channel-major: V_cn = Wv @ Xk + bv   (C, N) — plain matmul, no transpose.
        v_cn = jnp.dot(wv_ref[...], xk,
                       preferred_element_type=jnp.float32) + bv_ref[...]

        # Context directly channel-major (trans-B dot_general, flash-attn pattern):
        # ctx[c, q] = sum_m V_cn[c, m] * att[q, m]  → (C, tq). The MXU produces the
        # lane-dense layout; no XLU transpose, no per-batch epilogue loop.
        ctx_cn = jax.lax.dot_general(
            v_cn.astype(cd), att.astype(cd),
            dimension_numbers=(((1,), (1,)), ((), ())),
            preferred_element_type=jnp.float32)                           # (C, tq)

        out_ref[...] = (gamma_ref[0] * ctx_cn + xres_ref[...]).astype(out_ref.dtype)
        att_ref[...] = att.astype(att_ref.dtype)

    return kernel


def self_attn_pallas(x_nchw, wq, bq, wk, bk, wv, bv, gamma, *,
                     q_block=128, compute_dtype=jnp.bfloat16,
                     att_dtype=jnp.float32):
    """x_nchw: (B, C, W, H) f32.  Returns (out (B,C,W,H), attention (B,N,N)).

    compute_dtype controls the MXU input precision (f32 accumulation always);
    att_dtype can be set to bfloat16 to halve the dominant att writeback traffic.
    `bk` is accepted for API parity but only affects softmax-invariant terms,
    so it is (exactly) irrelevant to the module's returned values.
    """
    B, C, W, H = x_nchw.shape
    N = W * H

    # Query tile: lane-dense (multiple of 128) when it divides N, else whole N.
    if N % q_block == 0 and q_block % 8 == 0:
        tq = q_block
    else:
        tq = N
    n_qt = N // tq

    # Channel-major (== NCHW-flat) view is a free reshape; used for keys/values
    # (bf16) and for the exact f32 residual add.
    x_cn = x_nchw.reshape(B, C, N)
    x_keys = x_cn.astype(compute_dtype)
    # Token-major copy only feeds the query-side projection (wrapper-side cast
    # is what actually shrinks the HBM->VMEM DMA).
    x_tok = jnp.transpose(x_nchw, (0, 2, 3, 1)).reshape(B, N, C).astype(compute_dtype)

    # Bilinear fold of the Q/K projections (done once in XLA).
    m_mat = (wq.T @ wk).astype(compute_dtype)                 # (C, C)  Wq^T Wk
    w_row = (wk.T @ bq).reshape(1, C).astype(jnp.float32)     # (1, C)  Wk^T bq
    wv_mat = wv.astype(compute_dtype)                         # (C, C)  used channel-major
    bv_col = bv.reshape(C, 1).astype(jnp.float32)             # (C, 1)
    gamma_s = jnp.asarray(gamma, jnp.float32).reshape(1)      # SMEM scalar

    kernel = _make_self_attn_kernel(compute_dtype)

    # Explicit VMEM budget (per perf review, matters on v7x's 64 MiB VMEM):
    # rough per-step bytes, 2x margin, clamped to [32 MiB, 64 MiB].
    itm = jnp.dtype(compute_dtype).itemsize
    att_itm = jnp.dtype(att_dtype).itemsize
    est = (2 * (tq * C + C * N) * itm            # x_q + x_keys blocks (double-buffered)
           + 2 * C * tq * 4 + 2 * C * tq * 4     # residual in + out blocks
           + 2 * tq * N * att_itm                # att output block
           + 4 * tq * N * 4 + C * N * 4)         # energy/p/att temporaries + V_cn
    vmem_limit = int(min(max(2 * est, 32 * 1024 * 1024), 64 * 1024 * 1024))

    out_cn, att = pl.pallas_call(
        kernel,
        out_shape=(
            jax.ShapeDtypeStruct((B, C, N), x_nchw.dtype),   # channel-major == NCHW flat
            jax.ShapeDtypeStruct((B, N, N), att_dtype),
        ),
        grid=(B, n_qt),
        in_specs=[
            pl.BlockSpec((None, tq, C), lambda b, q: (b, q, 0)),    # x query tile (token-major)
            pl.BlockSpec((None, C, N), lambda b, q: (b, 0, 0)),     # x keys/values (channel-major)
            pl.BlockSpec((None, C, tq), lambda b, q: (b, 0, q)),    # residual slice (f32)
            pl.BlockSpec((C, C), lambda b, q: (0, 0)),              # Wq^T Wk
            pl.BlockSpec((1, C), lambda b, q: (0, 0)),              # Wk^T bq
            pl.BlockSpec((C, C), lambda b, q: (0, 0)),              # Wv
            pl.BlockSpec((C, 1), lambda b, q: (0, 0)),              # bv
            pl.BlockSpec(memory_space=pltpu.MemorySpace.SMEM),      # gamma scalar
        ],
        out_specs=(
            pl.BlockSpec((None, C, tq), lambda b, q: (b, 0, q)),    # out: lane-dense (C, tq)
            pl.BlockSpec((None, tq, N), lambda b, q: (b, q, 0)),    # attention: lane-dense (tq, N)
        ),
        compiler_params=pltpu.CompilerParams(
            dimension_semantics=("parallel", "parallel"),
            vmem_limit_bytes=vmem_limit),
    )(x_tok, x_keys, x_cn, m_mat, w_row, wv_mat, bv_col, gamma_s)

    out_nchw = out_cn.reshape(B, C, W, H)   # already channel-major: reshape only
    return out_nchw, att


def self_attn_reference(x, wq, bq, wk, bk, wv, bv, gamma):
    """Pure-JAX reference mirroring the PyTorch forward (NCHW, f32)."""
    B, C, W, H = x.shape
    N = W * H

    def conv1x1(x, w, b):
        return jnp.einsum('bcwh,oc->bowh', x, w) + b[None, :, None, None]

    proj_q = conv1x1(x, wq, bq).reshape(B, -1, N).transpose(0, 2, 1)   # (B, N, Cq)
    proj_k = conv1x1(x, wk, bk).reshape(B, -1, N)                      # (B, Cq, N)
    energy = jnp.einsum('bnc,bcm->bnm', proj_q, proj_k)                # (B, N, N)
    att = jax.nn.softmax(energy, axis=-1)
    proj_v = conv1x1(x, wv, bv).reshape(B, -1, N)                      # (B, C, N)
    out = jnp.einsum('bcm,bnm->bcn', proj_v, att).reshape(B, C, W, H)
    out = gamma * out + x
    return out, att


if __name__ == "__main__":
    B, C, W, H = 2, 32, 16, 16       # in_dim = 32 -> query/key channels = 4; N = 256
    Cq = C // 8
    N = W * H

    key = jax.random.PRNGKey(0)
    kx, kwq, kbq, kwk, kbk, kwv, kbv = jax.random.split(key, 7)

    x = jax.random.normal(kx, (B, C, W, H), dtype=jnp.float32)

    # 1x1 conv weights stored squeezed as (C_out, C_in); biases as (C_out,)
    wq = jax.random.normal(kwq, (Cq, C), dtype=jnp.float32) * 0.1
    bq = jax.random.normal(kbq, (Cq,), dtype=jnp.float32) * 0.1
    wk = jax.random.normal(kwk, (Cq, C), dtype=jnp.float32) * 0.1
    bk = jax.random.normal(kbk, (Cq,), dtype=jnp.float32) * 0.1
    wv = jax.random.normal(kwv, (C, C), dtype=jnp.float32) * 0.1
    bv = jax.random.normal(kbv, (C,), dtype=jnp.float32) * 0.1
    gamma = jnp.float32(0.5)   # TODO(synk): PyTorch init is 0; nonzero so the attention path is exercised.

    out, att = self_attn_pallas(x, wq, bq, wk, bk, wv, bv, gamma)
    out = jax.block_until_ready(out)
    att = jax.block_until_ready(att)

    out_ref, att_ref = self_attn_reference(x, wq, bq, wk, bk, wv, bv, gamma)

    assert out.shape == (B, C, W, H) and att.shape == (B, N, N)
    # bf16 MXU inputs (f32 accumulation, f32 softmax, f32 residual) -> tolerances
    # sized for bf16 rounding of the matmul inputs.
    np.testing.assert_allclose(np.asarray(att), np.asarray(att_ref), rtol=1e-2, atol=5e-3)
    np.testing.assert_allclose(np.asarray(out), np.asarray(out_ref), rtol=1e-2, atol=5e-3)

    print("KERNEL_OK")
</pallas_src>

<mosaic_0001>
module attributes {stable_mosaic.version = 11 : i64} {
  func.func @kernel(%arg0: i32, %arg1: i32, %arg2: memref<1x128x32xbf16, #tpu.memory_space<vmem>>, %arg3: memref<1x32x256xbf16, #tpu.memory_space<vmem>>, %arg4: memref<1x32x128xf32, #tpu.memory_space<vmem>>, %arg5: memref<32x32xbf16, #tpu.memory_space<vmem>>, %arg6: memref<1x32xf32, #tpu.memory_space<vmem>>, %arg7: memref<32x32xbf16, #tpu.memory_space<vmem>>, %arg8: memref<32x1xf32, #tpu.memory_space<vmem>>, %arg9: memref<1xf32, #tpu.memory_space<smem>>, %arg10: memref<1x32x128xf32, #tpu.memory_space<vmem>>, %arg11: memref<1x128x256xf32, #tpu.memory_space<vmem>>) attributes {dimension_semantics = [#tpu.dimension_semantics<parallel>, #tpu.dimension_semantics<parallel>], iteration_bounds = array<i64: 2, 2>, scalar_prefetch = 0 : i64, scratch_operands = 0 : i64, tpu.core_type = #tpu.core_type<tc>, window_params = [{transform_indices = @transform_0, window_bounds = array<i64: 1, 128, 32>}, {transform_indices = @transform_1, window_bounds = array<i64: 1, 32, 256>}, {transform_indices = @transform_2, window_bounds = array<i64: 1, 32, 128>}, {pipeline_mode = #tpu.pipeline_mode<synchronous>, transform_indices = @transform_3, window_bounds = array<i64: 32, 32>}, {pipeline_mode = #tpu.pipeline_mode<synchronous>, transform_indices = @transform_4, window_bounds = array<i64: 1, 32>}, {pipeline_mode = #tpu.pipeline_mode<synchronous>, transform_indices = @transform_5, window_bounds = array<i64: 32, 32>}, {pipeline_mode = #tpu.pipeline_mode<synchronous>, transform_indices = @transform_6, window_bounds = array<i64: 32, 1>}, {transform_indices = @transform_7, window_bounds = array<i64: 1>}, {transform_indices = @transform_8, window_bounds = array<i64: 1, 32, 128>}, {transform_indices = @transform_9, window_bounds = array<i64: 1, 128, 256>}]} {
    %c0 = arith.constant 0 : index
    %c0_0 = arith.constant 0 : index
    %c0_1 = arith.constant 0 : index
    %0 = vector.load %arg2[%c0, %c0_0, %c0_1] : memref<1x128x32xbf16, #tpu.memory_space<vmem>>, vector<1x128x32xbf16>
    %1 = vector.shape_cast %0 : vector<1x128x32xbf16> to vector<128x32xbf16>
    %c0_2 = arith.constant 0 : index
    %c0_3 = arith.constant 0 : index
    %c0_4 = arith.constant 0 : index
    %2 = vector.load %arg3[%c0_2, %c0_3, %c0_4] : memref<1x32x256xbf16, #tpu.memory_space<vmem>>, vector<1x32x256xbf16>
    %3 = vector.shape_cast %2 : vector<1x32x256xbf16> to vector<32x256xbf16>
    %c0_5 = arith.constant 0 : index
    %c0_6 = arith.constant 0 : index
    %4 = vector.load %arg5[%c0_5, %c0_6] : memref<32x32xbf16, #tpu.memory_space<vmem>>, vector<32x32xbf16>
    %cst = arith.constant dense<0.000000e+00> : vector<128x32xf32>
    %5 = tpu.matmul %1, %4, %cst {dimension_numbers = #tpu.dot_dimension_numbers<[1], [0], [0], [1], [0, 0, 1, 1], [], []>} : vector<128x32xbf16>, vector<32x32xbf16>, vector<128x32xf32> -> vector<128x32xf32>
    %c0_7 = arith.constant 0 : index
    %c0_8 = arith.constant 0 : index
    %6 = vector.load %arg6[%c0_7, %c0_8] : memref<1x32xf32, #tpu.memory_space<vmem>>, vector<1x32xf32>
    %7 = vector.broadcast %6 : vector<1x32xf32> to vector<128x32xf32>
    %8 = arith.addf %5, %7 : vector<128x32xf32>
    %9 = arith.truncf %8 : vector<128x32xf32> to vector<128x32xbf16>
    %cst_9 = arith.constant dense<0.000000e+00> : vector<128x256xf32>
    %10 = tpu.matmul %9, %3, %cst_9 {dimension_numbers = #tpu.dot_dimension_numbers<[1], [0], [0], [1], [0, 0, 1, 1], [], []>} : vector<128x32xbf16>, vector<32x256xbf16>, vector<128x256xf32> -> vector<128x256xf32>
    %cst_10 = arith.constant dense<0xFF800000> : vector<128xf32>
    %11 = vector.multi_reduction <maximumf>, %10, %cst_10 [1] : vector<128x256xf32> to vector<128xf32>
    %12 = vector.shape_cast %11 : vector<128xf32> to vector<128x1xf32>
    %13 = vector.broadcast %12 : vector<128x1xf32> to vector<128x256xf32>
    %14 = arith.subf %10, %13 : vector<128x256xf32>
    %15 = math.exp %14 : vector<128x256xf32>
    %cst_11 = arith.constant dense<0.000000e+00> : vector<128xf32>
    %16 = vector.multi_reduction <add>, %15, %cst_11 [1] : vector<128x256xf32> to vector<128xf32>
    %17 = vector.shape_cast %16 : vector<128xf32> to vector<128x1xf32>
    %cst_12 = arith.constant 1.000000e+00 : f32
    %18 = vector.broadcast %cst_12 : f32 to vector<128x1xf32>
    %19 = arith.divf %18, %17 : vector<128x1xf32>
    %20 = vector.broadcast %19 : vector<128x1xf32> to vector<128x256xf32>
    %21 = arith.mulf %15, %20 : vector<128x256xf32>
    %c0_13 = arith.constant 0 : index
    %c0_14 = arith.constant 0 : index
    %22 = vector.load %arg7[%c0_13, %c0_14] : memref<32x32xbf16, #tpu.memory_space<vmem>>, vector<32x32xbf16>
    %cst_15 = arith.constant dense<0.000000e+00> : vector<32x256xf32>
    %23 = tpu.matmul %22, %3, %cst_15 {dimension_numbers = #tpu.dot_dimension_numbers<[1], [0], [0], [1], [0, 0, 1, 1], [], []>} : vector<32x32xbf16>, vector<32x256xbf16>, vector<32x256xf32> -> vector<32x256xf32>
    %c0_16 = arith.constant 0 : index
    %c0_17 = arith.constant 0 : index
    %24 = vector.load %arg8[%c0_16, %c0_17] : memref<32x1xf32, #tpu.memory_space<vmem>>, vector<32x1xf32>
    %25 = vector.broadcast %24 : vector<32x1xf32> to vector<32x256xf32>
    %26 = arith.addf %23, %25 : vector<32x256xf32>
    %27 = arith.truncf %26 : vector<32x256xf32> to vector<32x256xbf16>
    %28 = arith.truncf %21 : vector<128x256xf32> to vector<128x256xbf16>
    %cst_18 = arith.constant dense<0.000000e+00> : vector<32x128xf32>
    %29 = tpu.matmul %27, %28, %cst_18 {dimension_numbers = #tpu.dot_dimension_numbers<[1], [1], [0], [0], [0, 0, 1, 0], [], []>} : vector<32x256xbf16>, vector<128x256xbf16>, vector<32x128xf32> -> vector<32x128xf32>
    %c0_19 = arith.constant 0 : index
    %30 = memref.load %arg9[%c0_19] : memref<1xf32, #tpu.memory_space<smem>>
    %31 = vector.broadcast %30 : f32 to vector<32x128xf32>
    %32 = arith.mulf %31, %29 : vector<32x128xf32>
    %c0_20 = arith.constant 0 : index
    %c0_21 = arith.constant 0 : index
    %c0_22 = arith.constant 0 : index
    %33 = vector.load %arg4[%c0_20, %c0_21, %c0_22] : memref<1x32x128xf32, #tpu.memory_space<vmem>>, vector<1x32x128xf32>
    %34 = vector.shape_cast %33 : vector<1x32x128xf32> to vector<32x128xf32>
    %35 = arith.addf %32, %34 : vector<32x128xf32>
    %c0_23 = arith.constant 0 : index
    %c0_24 = arith.constant 0 : index
    %c0_25 = arith.constant 0 : index
    %36 = vector.load %arg10[%c0_23, %c0_24, %c0_25] : memref<1x32x128xf32, #tpu.memory_space<vmem>>, vector<1x32x128xf32>
    %37 = vector.shape_cast %36 : vector<1x32x128xf32> to vector<32x128xf32>
    %38 = vector.shape_cast %35 : vector<32x128xf32> to vector<1x32x128xf32>
    tpu.vector_store %arg10[%c0_23, %c0_24, %c0_25], %38 {strides = array<i32>} : memref<1x32x128xf32, #tpu.memory_space<vmem>>, vector<1x32x128xf32>,
    %c0_26 = arith.constant 0 : index
    %c0_27 = arith.constant 0 : index
    %c0_28 = arith.constant 0 : index
    %39 = vector.load %arg11[%c0_26, %c0_27, %c0_28] : memref<1x128x256xf32, #tpu.memory_space<vmem>>, vector<1x128x256xf32>
    %40 = vector.shape_cast %39 : vector<1x128x256xf32> to vector<128x256xf32>
    %41 = vector.shape_cast %21 : vector<128x256xf32> to vector<1x128x256xf32>
    tpu.vector_store %arg11[%c0_26, %c0_27, %c0_28], %41 {strides = array<i32>} : memref<1x128x256xf32, #tpu.memory_space<vmem>>, vector<1x128x256xf32>,
    return
  }
  func.func @transform_0(%arg0: i32, %arg1: i32) -> (i32, i32, i32) {
    %c0_i32 = arith.constant 0 : i32
    %c0_i32_0 = arith.constant 0 : i32
    return %arg0, %arg1, %c0_i32 : i32, i32, i32
  }
  func.func @transform_1(%arg0: i32, %arg1: i32) -> (i32, i32, i32) {
    %c0_i32 = arith.constant 0 : i32
    %c0_i32_0 = arith.constant 0 : i32
    %c0_i32_1 = arith.constant 0 : i32
    return %arg0, %c0_i32, %c0_i32_0 : i32, i32, i32
  }
  func.func @transform_2(%arg0: i32, %arg1: i32) -> (i32, i32, i32) {
    %c0_i32 = arith.constant 0 : i32
    %c0_i32_0 = arith.constant 0 : i32
    return %arg0, %c0_i32, %arg1 : i32, i32, i32
  }
  func.func @transform_3(%arg0: i32, %arg1: i32) -> (i32, i32) {
    %c0_i32 = arith.constant 0 : i32
    %c0_i32_0 = arith.constant 0 : i32
    %c0_i32_1 = arith.constant 0 : i32
    return %c0_i32, %c0_i32_0 : i32, i32
  }
  func.func @transform_4(%arg0: i32, %arg1: i32) -> (i32, i32) {
    %c0_i32 = arith.constant 0 : i32
    %c0_i32_0 = arith.constant 0 : i32
    %c0_i32_1 = arith.constant 0 : i32
    return %c0_i32, %c0_i32_0 : i32, i32
  }
  func.func @transform_5(%arg0: i32, %arg1: i32) -> (i32, i32) {
    %c0_i32 = arith.constant 0 : i32
    %c0_i32_0 = arith.constant 0 : i32
    %c0_i32_1 = arith.constant 0 : i32
    return %c0_i32, %c0_i32_0 : i32, i32
  }
  func.func @transform_6(%arg0: i32, %arg1: i32) -> (i32, i32) {
    %c0_i32 = arith.constant 0 : i32
    %c0_i32_0 = arith.constant 0 : i32
    %c0_i32_1 = arith.constant 0 : i32
    return %c0_i32, %c0_i32_0 : i32, i32
  }
  func.func @transform_7(%arg0: i32, %arg1: i32) -> i32 {
    %c0_i32 = arith.constant 0 : i32
    %c0_i32_0 = arith.constant 0 : i32
    return %c0_i32 : i32
  }
  func.func @transform_8(%arg0: i32, %arg1: i32) -> (i32, i32, i32) {
    %c0_i32 = arith.constant 0 : i32
    %c0_i32_0 = arith.constant 0 : i32
    return %arg0, %c0_i32, %arg1 : i32, i32, i32
  }
  func.func @transform_9(%arg0: i32, %arg1: i32) -> (i32, i32, i32) {
    %c0_i32 = arith.constant 0 : i32
    %c0_i32_0 = arith.constant 0 : i32
    return %arg0, %arg1, %c0_i32 : i32, i32, i32
  }
}

</mosaic_0001>

<bundles_post_ra>
// kernel: tpu_custom_call.1
= control target key start
LH: loop header
LB: loop body
LE: loop exit
PB: predicated region body
PF: predicated region fallthrough
CT: control target
= control target key end

     0   :  { %s2542_s0 = inlined_call_operand.vmem [shape: bf16[2,256,32], index: 0, kind: input, shape index: {}]   ;;  %s2543_s1 = inlined_call_operand.vmem [shape: bf16[2,32,256], index: 1, kind: input, shape index: {}]   ;;  %s2544_s2 = inlined_call_operand.vmem [shape: f32[2,32,256], index: 2, kind: input, shape index: {}]   ;;  %s2545_s3 = inlined_call_operand.vmem [shape: bf16[32,32], index: 3, kind: input, shape index: {}]   ;;  %s2546_s4 = inlined_call_operand.vmem [shape: f32[1,32], index: 4, kind: input, shape index: {}]   ;;  %s2547_s5 = inlined_call_operand.vmem [shape: bf16[32,32], index: 5, kind: input, shape index: {}]   ;;  %s2548_s6 = inlined_call_operand.vmem [shape: f32[32,1], index: 6, kind: input, shape index: {}]   ;;  %s2549_s7 = inlined_call_operand.<no memory space> [shape: f32[1], index: 7, kind: input, shape index: {}]   ;;  %s2550_s8 = inlined_call_operand.hbm [shape: f32[2,32,256], index: 8, kind: output, shape index: {0}]   ;;  %s2551_s9 = inlined_call_operand.hbm [shape: f32[2,256,256], index: 9, kind: output, shape index: {1}]  }
   0x1   :  { %2554 = sst [smem:[#allocation12_spill]] %s2542_s0 }
   0x2   :  { %2555 = sst [smem:[#allocation13_spill]] %s2543_s1 }
   0x3   :  { %15 = sst [smem:[#allocation2]] %s2549_s7 }
   0x4   :  { %16 = vsyncpa [#allocation5], 0 }
   0x5   :  { %18 = vsyncpa [#allocation5 + $0x1], 0 }
   0x6   :  { %19 = vsyncpa [#allocation7], 0 }
   0x7   :  { %21 = vsyncpa [#allocation7 + $0x1], 0  ;;  %s1974_s11 = smov 0   ;;  %s1976_s12 = smov 0  }
   0x8   :  { %s1978_s13 = smov 0   ;;  %s1980_s14 = smov 0  }
   0x9   :  { %s1982_s15 = smov 0   ;;  %s1984_s16 = smov 0  }
   0xa   :  { %s1986_s17 = smov 0   ;;  %s1988_s18 = smov 0  }
   0xb LB: > { %s1496_s7 = sadd.s32 4294967295, %s1912_s18   ;;  %s1497_s19 = sadd.s32 4294967294, %s1912_s18   ;;  %s1912_s18 = sphi %s1988_s18, %s27_s18   ;;  %s1908_s17 = sphi %s1986_s17, %s2571_s17   ;;  %s1904_s16 = sphi %s1984_s16, %s2570_s16   ;;  %s1900_s15 = sphi %s1982_s15, %s2569_s15   ;;  %s1896_s14 = sphi %s1980_s14, %s2568_s14   ;;  %s1892_s13 = sphi %s1978_s13, %s2567_s13   ;;  %s1888_s12 = sphi %s1976_s12, %s2566_s12   ;;  %s1884_s11 = sphi %s1974_s11, %s2565_s11  }
   0xc   : > { %s36_s20 = sadd.s32 1, %s1904_s16  ;;  %s39_s21 = sadd.s32 1, %s1908_s17 }
   0xd   : > { %p37_p0 = scmp.ge.s32.totalorder %s36_s20, 2  ;;  %p109_p1 = scmp.ne.s32.totalorder %s1892_s13, %s1888_s12 }
   0xe   : > { %p110_p2 = scmp.eq.s32.totalorder %s1912_s18, 0  ;;  %p246_p5 = scmp.eq.s32.totalorder %s1496_s7, 3 }
   0xf   : > { %s2573_s20 = smov (%p37_p0, %s36_s20), 0  ;;  %s2575_s21 = smov (!%p37_p0, %s39_s21), %s1908_s17 }
  0x10   : > { %2556 = sst [smem:[#allocation10_spill]] %s2573_s20  ;;  %s98_s22 = ssub.s32 %s1904_s16, %s2573_s20 }
  0x11   : > { %p2026_p3 = por %p110_p2, %p109_p1  ;;  %p41_p4 = scmp.ge.s32.totalorder %s2575_s21, 2 }
  0x12   : > { %p251_p6 = scmp.ne.s32.totalorder %s1888_s12, %s1884_s11  ;;  %p252_p7 = scmp.eq.s32.totalorder %s1497_s19, 3 }
  0x13   : > { %s2577_s21 = smov (%p41_p4, %s2575_s21), 0  ;;  %p2034_p8 = por %p246_p5, %p109_p1 }
  0x14   : > { %2558 = sst [smem:[#allocation11_spill]] %s2577_s21  ;;  %p2038_p9 = por %p252_p7, %p251_p6 }
  0x15   : > { %s97_s26 = ssub.s32 %s1908_s17, %s2577_s21  ;;  %s102_s28 = sadd.s32 1, %s1892_s13 }
  0x16   : > { %s99_s27 = sor.u32 %s98_s22, %s97_s26  ;;  %p1499_p11 = scmp.ge.s32.totalorder %s1912_s18, 4 }
  0x17   : > { %p100_p10 = scmp.eq.s32.totalorder %s99_s27, 0 }
  0x18   : > { %311 = sbr.rel (%p1499_p11) target bundleno = 39 (0x27), region = 36 }
  0x19   : > { %s2046_s29 = scalar_select %p100_p10, %s1892_s13, %s102_s28  }
  0x1f   : > { %335 = sbr.rel (!%p2026_p3) target bundleno = 39 (0x27), region = 48  ;;  %s337_s30 = sand.u32 (%p2026_p3), 1, %s1892_s13  }
  0x20   : > { %s1501_s10 = sshll.u32 (%p2026_p3), %s1908_s17, 3  ;;  %s1500_s7 = sshll.u32 (%p2026_p3), %s337_s30, 5 }
  0x21   : > { %s341_s19 = sadd.s32 (%p2026_p3), %s1904_s16, %s1501_s10  ;;  %s339_s27 = scalar_lea.vmem (%p2026_p3), [#allocation3], %s1500_s7 }
  0x22   : > { %s1502_s20 = sshll.u32 (%p2026_p3), %s341_s19, 3 }
  0x23   : > { %s343_s26 = scalar_lea.vmem (%p2026_p3), %s2544_s2, %s1502_s20 }
  0x24   : > { %v377_v0 = vld [vmem:[%s343_s26] sm:$0xff] (%p2026_p3)  ;;  %v379_v1 = vld [vmem:[%s343_s26 + $0x10] sm:$0xff] (%p2026_p3) }
  0x25   : > { %v381_v2 = vld [vmem:[%s343_s26 + $0x20] sm:$0xff] (%p2026_p3)  ;;  %378 = vst [vmem:[%s339_s27] sm:$0xff] (%p2026_p3), %v377_v0  ;;  %380 = vst [vmem:[%s339_s27 + $0x8] sm:$0xff] (%p2026_p3), %v379_v1  ;;  %v383_v3 = vld [vmem:[%s343_s26 + $0x30] sm:$0xff] (%p2026_p3) }
  0x26   : > { %382 = vst [vmem:[%s339_s27 + $0x10] sm:$0xff] %v381_v2  ;;  %384 = vst [vmem:[%s339_s27 + $0x18] sm:$0xff] %v383_v3 }
  0x27 PF: > { %p1503_p12 = scmp.ge.s32.totalorder %s1912_s18, 1  ;;  %p389_p13 = scmp.lt.s32.totalorder %s1912_s18, 5 }
  0x29   : > { %p390_p0 = pnand %p1503_p12, %p389_p13 }
  0x2a   : > { %v1672_v4 = vld [vmem:[%s2545_s3] sm:$0xff] (!%p390_p0)   ;;  %s1507_s20 = sshll.u32 (!%p390_p0), %s1896_s14, 4  ;;  %v1673_v5 = vld [vmem:[%s2545_s3 + $0x8] sm:$0xff] (!%p390_p0)   ;;  %p451_p1 = scmp.lt.s32.totalorder (!%p390_p0), %s1900_s15, 1  ;;  %vm550_vm0 = vcmask (!%p390_p0), 261120   ;;  %v1914_v18 = vmov (!%p390_p0), 0  }
  0x2b   : > { %393 = sbr.rel (%p390_p0) target bundleno = 1165 (0x48d), region = 86  ;;  %1569 = vmatprep.subr.bf16.mxu0 (!%p390_p0), %v1672_v4  ;;  %p453_p2 = scmp.lt.s32.totalorder (!%p390_p0), %s1507_s20, 31  ;;  %756 = vmatprep.mubr.bf16.mxu1 (!%p390_p0), %v1914_v18  ;;  %v1512_v20 = vld [vmem:[%s2546_s4] ss:$0 sm:$0xff] (!%p390_p0) }
  0x2c   : > { %1570 = vmatpush3.bf16.msra.mxu0 (!%p390_p0), %v1672_v4  ;;  %s2561_s0 = sld [smem:[#allocation12_spill]] (!%p390_p0)  ;;  %s2562_s1 = sld [smem:[#allocation13_spill]] (!%p390_p0)  ;;  %1671 = vset.pattern.permute.xlu1 (!%p390_p0), %v1914_v18  ;;  %v1688_v60 = vld [vmem:[%s2547_s5] sm:$0xff] (!%p390_p0)  }
  0x2d   : > { %1571 = vmatprep.subr.bf16.mxu0 (!%p390_p0), %v1673_v5  ;;  %1670 = vset.pattern.permute.xlu0 (!%p390_p0), %v1914_v18  ;;  %s1558_s27 = sshll.u32 (!%p390_p0), %s1896_s14, 5 }
  0x30   : > { %1572 = vmatpush3.bf16.msra.mxu0 (!%p390_p0), %v1673_v5 }
  0x32   : > { %s452_s10 = scalar_select %p451_p1, %s1900_s15, 1 }
  0x33   : > { %s2579_s20 = smov (!%p453_p2, %s1507_s20), 31 }
  0x34   : > { %s1508_s7 = sshll.u32 %s452_s10, 5 }
  0x35   : > { %s456_s19 = sadd.s32 %s1508_s7, %s2579_s20  ;;  %s464_s28 = scalar_lea.vmem %s2562_s1, %s1508_s7 }
  0x36   : > { %s1509_s22 = sshll.u32 %s456_s19, 2  ;;  %v1682_v14 = vld [vmem:[%s464_s28 + $0x4] ss:$8 sps:$4 sm:$0xff]   ;;  %v1684_v15 = vld [vmem:[%s464_s28] ss:$8 sps:$4 sm:$0xff]   ;;  %s2366_s19 = sand.u32 1, %s1888_s12  }
  0x37   : > { %s458_s23 = scalar_lea.vmem %s2561_s0, %s1509_s22  ;;  %724 = vmatprep.subr.bf16.mxu1 %v1682_v14  ;;  %1137 = vmatprep.subr.bf16.mxu0 %v1682_v14  ;;  %v1685_v16 = vld [vmem:[%s464_s28 + $0x14] ss:$8 sps:$4 sm:$0xff]   ;;  %v1687_v17 = vld [vmem:[%s464_s28 + $0x10] ss:$8 sps:$4 sm:$0xff]   ;;  %s1506_s22 = sshll.u32 %s2366_s19, 8 }
  0x38   : > { %v1674_v6 = vld [vmem:[%s458_s23] sm:$0xff]   ;;  %v1675_v7 = vld [vmem:[%s458_s23 + $0x8] sm:$0xff]   ;;  %v1676_v8 = vld [vmem:[%s458_s23 + $0x10] sm:$0xff]   ;;  %725 = vmatpush1.bf16.msra.mxu1 %v1684_v15  ;;  %s2371_s26 = scalar_lea.vmem [#allocation6], %s1506_s22  ;;  %s1315_s22 = scalar_lea.sflag [#allocation7], %s2366_s19 }
  0x39   : > { %1573 = vmatprep.mubr.msk.bf16.mxu0 %vm550_vm0, %v1674_v6  ;;  %v1677_v9 = vld [vmem:[%s458_s23 + $0x18] sm:$0xff]   ;;  %v1678_v10 = vld [vmem:[%s458_s23 + $0x20] sm:$0xff]   ;;  %v1679_v11 = vld [vmem:[%s458_s23 + $0x28] sm:$0xff]   ;;  %726 = vmatprep.subr.bf16.mxu1 %v1685_v16  ;;  %s1348_s28 = sshll.u32 %s2371_s26, 4  ;;  %s1915_s1 = smov [#allocation6]   ;;  %s2451_s28 = int_to_ptr.vmem [resolvable:$true] %s1348_s28 }
  0x3a   : > { %1574 = vmatmul.mubr.msk.bf16.vlgmr.msra.gmra.mrb[0].mxu0 %vm550_vm0, %v1675_v7  ;;  %v1680_v12 = vld [vmem:[%s458_s23 + $0x30] sm:$0xff]   ;;  %v1681_v13 = vld [vmem:[%s458_s23 + $0x38] sm:$0xff]   ;;  %s1553_s23 = sshll.u32 %s1900_s15, 6  ;;  %s1786_s0 = scalar_lea.vmem %s2451_s28, 4096 }
  0x3b   : > { %1577 = vmatprep.mubr.msk.bf16.mxu0 %vm550_vm0, %v1676_v8  ;;  %1138 = vmatpush1.bf16.msra.mxu0 %v1684_v15  ;;  %v1689_v15 = vld [vmem:[%s2547_s5 + $0x8] sm:$0xff]   ;;  %s1345_s21 = sadd.s32 %s1558_s27, %s1553_s23  ;;  %p1787_p3 = scmp.ne.s32.totalorder %s2451_s28, %s1786_s0 }
  0x3c   : > { %1139 = vmatprep.subr.bf16.mxu0 %v1685_v16  ;;  %727 = vmatpush1.bf16.msra.mxu1 %v1687_v17  ;;  %s1554_s20 = sshll.u32 %s1345_s21, 7  ;;  %s1790_s27 = sshll.u32 %s1915_s1, 4  ;;  %s1791_s27 = int_to_ptr.vmem [resolvable:$false] %s1790_s27 }
  0x3d   : > { %s2449_s7 = scalar_lea.hbm %s2551_s9, %s1554_s20  ;;  %p1788_p4 = pnand %p1787_p3, %p2034_p8 }
  0x3e   : > { %p1793_p6 = scmp.lt.s32.totalorder %s2451_s28, %s1791_s27 }
  0x3f   : > { %1140 = vmatpush1.bf16.msra.mxu0 %v1687_v17  ;;  %p1789_p5 = pneg %p1788_p4 }
  0x42   : > { %1578 = vmatmul.mubr.msk.bf16.gmra.mrb[4].mxu0 %vm550_vm0, %v1677_v9 }
  0x43   : > { %1581 = vmatprep.mubr.msk.bf16.mxu0 %vm550_vm0, %v1678_v10 }
  0x4a   : > { %1582 = vmatmul.mubr.msk.bf16.gmra.mrb[8].mxu0 %vm550_vm0, %v1679_v11 }
  0x4b   : > { %1585 = vmatprep.mubr.msk.bf16.mxu0 %vm550_vm0, %v1680_v12 }
  0x52   : > { %1586 = vmatmul.mubr.msk.bf16.gmra.mrb[12].mxu0 %vm550_vm0, %v1681_v13 }
  0x53   : > { %1169 = vmatprep.mubr.bf16.mxu0 %v1914_v18 }
  0x5a   : > { %1545 = vmatmul.mubr.msk.bf16.vlgmr.msra.gmra.mrb[16].mxu0 %vm550_vm0, %v1688_v60 }
  0x5b   : > { %1179 = vmatprep.mubr.bf16.mxu0 %v1914_v18 }
  0x62   : > { %1546 = vmatmul.mubr.msk.bf16.gmra.mrb[20].mxu0 %vm550_vm0, %v1689_v15 }
 0x10d   : > { %v1575_v19 = vpop.f32.mrb[0].mxu0 }
 0x10e   : > { %v609_v21 = vpop.f32.mrb[1].mxu0  ;;  %v618_v23 = vadd.f32 %v1575_v19, %v1512_v20 }
 0x10f   : > { %v1576_v22 = vpop.f32.mrb[2].mxu0  ;;  %v610_v26 = vadd.f32 %v1512_v20, %v609_v21 }
 0x110   : > { %v621_v24 = vadd.f32 %v1576_v22, %v1512_v20  ;;  %v612_v25 = vpop.f32.mrb[3].mxu0 }
 0x111   : > { %v613_v27 = vadd.f32 %v1512_v20, %v612_v25 }
 0x112   : > { %v673_v28 = vpack.c.bf16 %v621_v24, %v618_v23 }
 0x113   : > { %v672_v29 = vpack.c.bf16 %v613_v27, %v610_v26 }
 0x115   : > { %1535 = vmatmul.mubr.msk.bf16.vlgmr.msra.gmra.mrb[0].mxu1 %vm550_vm0, %v672_v29  ;;  %v1579_v30 = vpop.f32.mrb[4].mxu0 }
 0x116   : > { %v634_v31 = vadd.f32 %v1579_v30, %v1512_v20  ;;  %v625_v32 = vpop.f32.mrb[5].mxu0  ;;  %766 = vmatprep.mubr.bf16.mxu1 %v1914_v18 }
 0x117   : > { %v626_v33 = vadd.f32 %v1512_v20, %v625_v32  ;;  %v1580_v34 = vpop.f32.mrb[6].mxu0 }
 0x118   : > { %v637_v35 = vadd.f32 %v1580_v34, %v1512_v20  ;;  %v628_v36 = vpop.f32.mrb[7].mxu0 }
 0x119   : > { %v629_v37 = vadd.f32 %v1512_v20, %v628_v36 }
 0x11a   : > { %v675_v38 = vpack.c.bf16 %v637_v35, %v634_v31 }
 0x11b   : > { %v674_v39 = vpack.c.bf16 %v629_v37, %v626_v33 }
 0x11d   : > { %1536 = vmatmul.mubr.msk.bf16.gmra.mrb[4].mxu1 %vm550_vm0, %v673_v28  ;;  %v1583_v40 = vpop.f32.mrb[8].mxu0 }
 0x11e   : > { %776 = vmatprep.mubr.bf16.mxu1 %v1914_v18  ;;  %v650_v41 = vadd.f32 %v1583_v40, %v1512_v20  ;;  %v641_v42 = vpop.f32.mrb[9].mxu0 }
 0x11f   : > { %v642_v43 = vadd.f32 %v1512_v20, %v641_v42  ;;  %v1584_v44 = vpop.f32.mrb[10].mxu0 }
 0x120   : > { %v653_v45 = vadd.f32 %v1584_v44, %v1512_v20  ;;  %v644_v46 = vpop.f32.mrb[11].mxu0 }
 0x121   : > { %v645_v47 = vadd.f32 %v1512_v20, %v644_v46 }
 0x122   : > { %v677_v48 = vpack.c.bf16 %v653_v45, %v650_v41 }
 0x123   : > { %v676_v49 = vpack.c.bf16 %v645_v47, %v642_v43 }
 0x125   : > { %1537 = vmatmul.mubr.msk.bf16.gmra.mrb[8].mxu1 %vm550_vm0, %v674_v39  ;;  %v1587_v50 = vpop.f32.mrb[12].mxu0 }
 0x126   : > { %786 = vmatprep.mubr.bf16.mxu1 %v1914_v18  ;;  %v666_v51 = vadd.f32 %v1587_v50, %v1512_v20  ;;  %v657_v52 = vpop.f32.mrb[13].mxu0 }
 0x127   : > { %v658_v53 = vadd.f32 %v1512_v20, %v657_v52  ;;  %v1588_v54 = vpop.f32.mrb[14].mxu0 }
 0x128   : > { %v669_v55 = vadd.f32 %v1588_v54, %v1512_v20  ;;  %v660_v56 = vpop.f32.mrb[15].mxu0 }
 0x129   : > { %v661_v57 = vadd.f32 %v1512_v20, %v660_v56 }
 0x12a   : > { %v679_v58 = vpack.c.bf16 %v669_v55, %v666_v51 }
 0x12b   : > { %v678_v59 = vpack.c.bf16 %v661_v57, %v658_v53 }
 0x12d   : > { %1538 = vmatmul.mubr.msk.bf16.gmra.mrb[12].mxu1 %vm550_vm0, %v675_v38 }
 0x12e   : > { %796 = vmatprep.mubr.bf16.mxu1 %v1914_v18 }
 0x135   : > { %1539 = vmatmul.mubr.msk.bf16.gmra.mrb[16].mxu1 %vm550_vm0, %v676_v49 }
 0x136   : > { %806 = vmatprep.mubr.bf16.mxu1 %v1914_v18 }
 0x13d   : > { %1540 = vmatmul.mubr.msk.bf16.gmra.mrb[20].mxu1 %vm550_vm0, %v677_v48 }
 0x13e   : > { %816 = vmatprep.mubr.bf16.mxu1 %v1914_v18 }
 0x145   : > { %1541 = vmatmul.mubr.msk.bf16.gmra.mrb[24].mxu1 %vm550_vm0, %v678_v59 }
 0x146   : > { %826 = vmatprep.mubr.bf16.mxu1 %v1914_v18 }
 0x14d   : > { %1542 = vmatmul.mubr.msk.bf16.gmra.mrb[28].mxu1 %vm550_vm0, %v679_v58 }
 0x1e8   : > { %v2109_v61 = vpop.f32.mrb[0].mxu1 }
 0x1e9   : > { %v2111_v62 = vpop.f32.mrb[1].mxu1 }
 0x1ea   : > { %v2113_v63 = vpop.f32.mrb[2].mxu1  ;;  %v837_v0 = vmax.f32 %v2109_v61, %v2111_v62 }
 0x1eb   : > { %v2117_v1 = vpop.f32.mrb[3].mxu1 }
 0x1ec   : > { %838 = vmax.xlane.f32.xlu0 %v837_v0  ;;  %v840_v2 = vmax.f32 %v2113_v63, %v2117_v1 }
 0x1f0   : > { %841 = vmax.xlane.f32.xlu0 %v840_v2  ;;  %v2121_v3 = vpop.f32.mrb[4].mxu1 }
 0x1f1   : > { %v2123_v4 = vpop.f32.mrb[5].mxu1 }
 0x1f2   : > { %v2125_v5 = vpop.f32.mrb[6].mxu1  ;;  %v843_v6 = vmax.f32 %v2121_v3, %v2123_v4 }
 0x1f3   : > { %v2129_v7 = vpop.f32.mrb[7].mxu1 }
 0x1f4   : > { %844 = vmax.xlane.f32.xlu1 %v843_v6  ;;  %v846_v8 = vmax.f32 %v2125_v5, %v2129_v7 }
 0x1f8   : > { %847 = vmax.xlane.f32.xlu1 %v846_v8  ;;  %v2133_v9 = vpop.f32.mrb[8].mxu1 }
 0x1f9   : > { %v2135_v10 = vpop.f32.mrb[9].mxu1 }
 0x1fa   : > { %v2137_v11 = vpop.f32.mrb[10].mxu1  ;;  %v849_v12 = vmax.f32 %v2133_v9, %v2135_v10 }
 0x1fb   : > { %v2141_v13 = vpop.f32.mrb[11].mxu1 }
 0x1fc   : > { %850 = vmax.xlane.f32.xlu0 %v849_v12  ;;  %v852_v14 = vmax.f32 %v2137_v11, %v2141_v13 }
 0x1fe   : > { %853 = vmax.xlane.f32.xlu1 %v852_v14 }
 0x200   : > { %v2149_v16 = vpop.f32.mrb[12].mxu1 }
 0x201   : > { %v2151_v17 = vpop.f32.mrb[13].mxu1 }
 0x202   : > { %v2153_v18 = vpop.f32.mrb[14].mxu1  ;;  %v855_v19 = vmax.f32 %v2149_v16, %v2151_v17 }
 0x203   : > { %v2157_v20 = vpop.f32.mrb[15].mxu1 }
 0x204   : > { %856 = vmax.xlane.f32.xlu0 %v855_v19  ;;  %v858_v21 = vmax.f32 %v2153_v18, %v2157_v20 }
 0x206   : > { %859 = vmax.xlane.f32.xlu1 %v858_v21 }
 0x208   : > { %v2161_v22 = vpop.f32.mrb[16].mxu1 }
 0x209   : > { %v2163_v23 = vpop.f32.mrb[17].mxu1 }
 0x20a   : > { %v2165_v24 = vpop.f32.mrb[18].mxu1  ;;  %v861_v25 = vmax.f32 %v2161_v22, %v2163_v23 }
 0x20b   : > { %v2169_v26 = vpop.f32.mrb[19].mxu1 }
 0x20c   : > { %862 = vmax.xlane.f32.xlu0 %v861_v25  ;;  %v864_v27 = vmax.f32 %v2165_v24, %v2169_v26 }
 0x20e   : > { %865 = vmax.xlane.f32.xlu1 %v864_v27 }
 0x210   : > { %v2173_v28 = vpop.f32.mrb[20].mxu1 }
 0x211   : > { %v2175_v29 = vpop.f32.mrb[21].mxu1 }
 0x212   : > { %v2177_v30 = vpop.f32.mrb[22].mxu1  ;;  %v867_v31 = vmax.f32 %v2173_v28, %v2175_v29 }
 0x213   : > { %v2181_v32 = vpop.f32.mrb[23].mxu1 }
 0x214   : > { %868 = vmax.xlane.f32.xlu0 %v867_v31  ;;  %v870_v33 = vmax.f32 %v2177_v30, %v2181_v32 }
 0x216   : > { %871 = vmax.xlane.f32.xlu1 %v870_v33 }
 0x218   : > { %v2185_v34 = vpop.f32.mrb[24].mxu1 }
 0x219   : > { %v2187_v35 = vpop.f32.mrb[25].mxu1 }
 0x21a   : > { %v2189_v36 = vpop.f32.mrb[26].mxu1  ;;  %v873_v37 = vmax.f32 %v2185_v34, %v2187_v35 }
 0x21b   : > { %v2193_v38 = vpop.f32.mrb[27].mxu1 }
 0x21c   : > { %874 = vmax.xlane.f32.xlu0 %v873_v37  ;;  %v876_v39 = vmax.f32 %v2189_v36, %v2193_v38 }
 0x21e   : > { %877 = vmax.xlane.f32.xlu1 %v876_v39 }
 0x220   : > { %v2197_v40 = vpop.f32.mrb[28].mxu1 }
 0x221   : > { %v2199_v41 = vpop.f32.mrb[29].mxu1 }
 0x222   : > { %v2201_v42 = vpop.f32.mrb[30].mxu1  ;;  %v879_v43 = vmax.f32 %v2197_v40, %v2199_v41 }
 0x223   : > { %v2205_v44 = vpop.f32.mrb[31].mxu1 }
 0x224   : > { %880 = vmax.xlane.f32.xlu0 %v879_v43  ;;  %v882_v45 = vmax.f32 %v2201_v42, %v2205_v44 }
 0x226   : > { %883 = vmax.xlane.f32.xlu1 %v882_v45 }
 0x279   : > { %v839_v46 = vpop.xlane.xlu0 %838 }
 0x27a   : > { %v885_v47 = vsub.f32 %v2109_v61, %v839_v46  ;;  %v886_v48 = vsub.f32 %v2111_v62, %v839_v46 }
 0x27c   : > { %v917_v49 = vmul.f32 1.442695, %v885_v47  ;;  %v919_v50 = vmul.f32 1.442695, %v886_v48 }
 0x27d   : > { %v842_v51 = vpop.xlane.xlu0 %841 }
 0x27e   : > { %1690 = vpow2.f32 %v917_v49  ;;  %v887_v52 = vsub.f32 %v2113_v63, %v842_v51  ;;  %v888_v53 = vsub.f32 %v2117_v1, %v842_v51 }
 0x27f   : > { %1692 = vpow2.f32 %v919_v50 }
 0x280   : > { %v921_v54 = vmul.f32 1.442695, %v887_v52  ;;  %v923_v55 = vmul.f32 1.442695, %v888_v53 }
 0x281   : > { %v845_v56 = vpop.xlane.xlu1 %844 }
 0x282   : > { %1694 = vpow2.f32 %v921_v54  ;;  %v889_v57 = vsub.f32 %v2121_v3, %v845_v56  ;;  %v890_v58 = vsub.f32 %v2123_v4, %v845_v56 }
 0x283   : > { %1696 = vpow2.f32 %v923_v55 }
 0x284   : > { %v925_v59 = vmul.f32 1.442695, %v889_v57  ;;  %v927_v60 = vmul.f32 1.442695, %v890_v58 }
 0x285   : > { %v848_v61 = vpop.xlane.xlu1 %847 }
 0x286   : > { %1698 = vpow2.f32 %v925_v59  ;;  %v891_v62 = vsub.f32 %v2125_v5, %v848_v61  ;;  %v892_v63 = vsub.f32 %v2129_v7, %v848_v61 }
 0x287   : > { %1700 = vpow2.f32 %v927_v60 }
 0x288   : > { %v2217_v0 = vpop.eup %1690  ;;  %v929_v1 = vmul.f32 1.442695, %v891_v62  ;;  %v931_v2 = vmul.f32 1.442695, %v892_v63 }
 0x289   : > { %v2219_v6 = vpop.eup %1692  ;;  %v851_v8 = vpop.xlane.xlu0 %850 }
 0x28a   : > { %1702 = vpow2.f32 %v929_v1  ;;  %v893_v3 = vsub.f32 %v2133_v9, %v851_v8  ;;  %v894_v4 = vsub.f32 %v2135_v10, %v851_v8  ;;  %v981_v12 = vadd.f32 %v2219_v6, %v2217_v0 }
 0x28b   : > { %1704 = vpow2.f32 %v931_v2  ;;  %v854_v5 = vpop.xlane.xlu1 %853 }
 0x28c   : > { %v2225_v14 = vpop.eup %1694  ;;  %v933_v7 = vmul.f32 1.442695, %v893_v3  ;;  %v935_v15 = vmul.f32 1.442695, %v894_v4  ;;  %v895_v19 = vsub.f32 %v2137_v11, %v854_v5  ;;  %v896_v21 = vsub.f32 %v2141_v13, %v854_v5  ;;  %982 = vadd.xlane.f32.xlu0 %v981_v12 }
 0x28d   : > { %v2229_v25 = vpop.eup %1696 }
 0x28e   : > { %1706 = vpow2.f32 %v933_v7  ;;  %v937_v9 = vmul.f32 1.442695, %v895_v19  ;;  %v939_v27 = vmul.f32 1.442695, %v896_v21  ;;  %v984_v10 = vadd.f32 %v2229_v25, %v2225_v14 }
 0x28f   : > { %1708 = vpow2.f32 %v935_v15 }
 0x290   : > { %v2233_v31 = vpop.eup %1698  ;;  %1710 = vpow2.f32 %v937_v9  ;;  %985 = vadd.xlane.f32.xlu1 %v984_v10 }
 0x291   : > { %v2235_v33 = vpop.eup %1700  ;;  %1712 = vpow2.f32 %v939_v27  ;;  %v857_v11 = vpop.xlane.xlu0 %856 }
 0x292   : > { %v897_v13 = vsub.f32 %v2149_v16, %v857_v11  ;;  %v898_v37 = vsub.f32 %v2151_v17, %v857_v11  ;;  %v987_v39 = vadd.f32 %v2235_v33, %v2233_v31 }
 0x293   : > { %v860_v43 = vpop.xlane.xlu1 %859 }
 0x294   : > { %v2241_v45 = vpop.eup %1702  ;;  %v941_v46 = vmul.f32 1.442695, %v897_v13  ;;  %v943_v47 = vmul.f32 1.442695, %v898_v37  ;;  %v899_v48 = vsub.f32 %v2153_v18, %v860_v43  ;;  %v900_v49 = vsub.f32 %v2157_v20, %v860_v43  ;;  %988 = vadd.xlane.f32.xlu0 %v987_v39 }
 0x295   : > { %v2245_v50 = vpop.eup %1704 }
 0x296   : > { %1714 = vpow2.f32 %v941_v46  ;;  %v945_v51 = vmul.f32 1.442695, %v899_v48  ;;  %v947_v16 = vmul.f32 1.442695, %v900_v49  ;;  %v990_v17 = vadd.f32 %v2245_v50, %v2241_v45 }
 0x297   : > { %1716 = vpow2.f32 %v943_v47 }
 0x298   : > { %v2249_v52 = vpop.eup %1706  ;;  %1718 = vpow2.f32 %v945_v51  ;;  %991 = vadd.xlane.f32.xlu1 %v990_v17 }
 0x299   : > { %v2251_v53 = vpop.eup %1708  ;;  %1720 = vpow2.f32 %v947_v16  ;;  %v863_v18 = vpop.xlane.xlu0 %862 }
 0x29a   : > { %v2253_v54 = vpop.eup %1710  ;;  %v901_v20 = vsub.f32 %v2161_v22, %v863_v18  ;;  %v902_v55 = vsub.f32 %v2163_v23, %v863_v18  ;;  %v993_v56 = vadd.f32 %v2251_v53, %v2249_v52 }
 0x29b   : > { %v2259_v57 = vpop.eup %1712  ;;  %v866_v58 = vpop.xlane.xlu1 %865 }
 0x29c   : > { %v949_v59 = vmul.f32 1.442695, %v901_v20  ;;  %v951_v60 = vmul.f32 1.442695, %v902_v55  ;;  %v903_v61 = vsub.f32 %v2165_v24, %v866_v58  ;;  %v904_v62 = vsub.f32 %v2169_v26, %v866_v58  ;;  %994 = vadd.xlane.f32.xlu0 %v993_v56 }
 0x29d   : > { %v996_v63 = vadd.f32 %v2259_v57, %v2253_v54 }
 0x29e   : > { %1722 = vpow2.f32 %v949_v59  ;;  %v953_v22 = vmul.f32 1.442695, %v903_v61  ;;  %v955_v1 = vmul.f32 1.442695, %v904_v62 }
 0x29f   : > { %1724 = vpow2.f32 %v951_v60  ;;  %997 = vadd.xlane.f32.xlu1 %v996_v63 }
 0x2a0   : > { %v2265_v23 = vpop.eup %1714  ;;  %1726 = vpow2.f32 %v953_v22 }
 0x2a1   : > { %v2267_v2 = vpop.eup %1716  ;;  %1728 = vpow2.f32 %v955_v1  ;;  %v869_v8 = vpop.xlane.xlu0 %868 }
 0x2a2   : > { %v2269_v3 = vpop.eup %1718  ;;  %v905_v24 = vsub.f32 %v2173_v28, %v869_v8  ;;  %v906_v26 = vsub.f32 %v2175_v29, %v869_v8  ;;  %v999_v4 = vadd.f32 %v2267_v2, %v2265_v23 }
 0x2a3   : > { %v2275_v12 = vpop.eup %1720  ;;  %v872_v5 = vpop.xlane.xlu1 %871 }
 0x2a4   : > { %v957_v7 = vmul.f32 1.442695, %v905_v24  ;;  %v959_v15 = vmul.f32 1.442695, %v906_v26  ;;  %v907_v19 = vsub.f32 %v2177_v30, %v872_v5  ;;  %v908_v21 = vsub.f32 %v2181_v32, %v872_v5  ;;  %1000 = vadd.xlane.f32.xlu0 %v999_v4  ;;  %v1098_v26 = vld [vmem:[%s2548_s6 + $0x8] sm:$0xff]  ;;  %v2332_v4 = vpop.f32.mrb[16].mxu0 }
 0x2a5   : > { %v1002_v9 = vadd.f32 %v2275_v12, %v2269_v3  ;;  %v2334_v5 = vpop.f32.mrb[17].mxu0 }
 0x2a6   : > { %1730 = vpow2.f32 %v957_v7  ;;  %v961_v28 = vmul.f32 1.442695, %v907_v19  ;;  %v963_v27 = vmul.f32 1.442695, %v908_v21  ;;  %v2336_v7 = vpop.f32.mrb[18].mxu0  ;;  %v1099_v19 = vld [vmem:[%s2548_s6 + $0x10] sm:$0xff] }
 0x2a7   : > { %1732 = vpow2.f32 %v959_v15  ;;  %1003 = vadd.xlane.f32.xlu1 %v1002_v9  ;;  %v2338_v15 = vpop.f32.mrb[19].mxu0 }
 0x2a8   : > { %v2281_v29 = vpop.eup %1722  ;;  %1734 = vpow2.f32 %v961_v28  ;;  %v2343_v21 = vpop.f32.mrb[20].mxu0  ;;  %v1097_v28 = vld [vmem:[%s2548_s6] sm:$0xff] }
 0x2a9   : > { %v2283_v10 = vpop.eup %1724  ;;  %1736 = vpow2.f32 %v963_v27  ;;  %v875_v11 = vpop.xlane.xlu0 %874 }
 0x2aa   : > { %v2285_v13 = vpop.eup %1726  ;;  %v909_v30 = vsub.f32 %v2185_v34, %v875_v11  ;;  %v910_v32 = vsub.f32 %v2187_v35, %v875_v11  ;;  %v1005_v37 = vadd.f32 %v2283_v10, %v2281_v29  ;;  %v2345_v9 = vpop.f32.mrb[21].mxu0 }
 0x2ab   : > { %v2291_v39 = vpop.eup %1728  ;;  %v878_v43 = vpop.xlane.xlu1 %877 }
 0x2ac   : > { %v965_v46 = vmul.f32 1.442695, %v909_v30  ;;  %v967_v47 = vmul.f32 1.442695, %v910_v32  ;;  %v911_v48 = vsub.f32 %v2189_v36, %v878_v43  ;;  %v912_v49 = vsub.f32 %v2193_v38, %v878_v43  ;;  %1006 = vadd.xlane.f32.xlu0 %v1005_v37 }
 0x2ad   : > { %v1008_v51 = vadd.f32 %v2291_v39, %v2285_v13 }
 0x2ae   : > { %1738 = vpow2.f32 %v965_v46  ;;  %v969_v34 = vmul.f32 1.442695, %v911_v48  ;;  %v971_v16 = vmul.f32 1.442695, %v912_v49  ;;  %v1100_v48 = vld [vmem:[%s2548_s6 + $0x18] sm:$0xff] }
 0x2af   : > { %1740 = vpow2.f32 %v967_v47  ;;  %1009 = vadd.xlane.f32.xlu1 %v1008_v51 }
 0x2b0   : > { %v2297_v35 = vpop.eup %1730  ;;  %1742 = vpow2.f32 %v969_v34 }
 0x2b1   : > { %v2299_v17 = vpop.eup %1732  ;;  %1744 = vpow2.f32 %v971_v16  ;;  %v881_v18 = vpop.xlane.xlu0 %880 }
 0x2b2   : > { %v2301_v20 = vpop.eup %1734  ;;  %v913_v36 = vsub.f32 %v2197_v40, %v881_v18  ;;  %v914_v38 = vsub.f32 %v2199_v41, %v881_v18  ;;  %v1011_v55 = vadd.f32 %v2299_v17, %v2297_v35 }
 0x2b3   : > { %v2307_v56 = vpop.eup %1736  ;;  %v884_v27 = vpop.xlane.xlu1 %883 }
 0x2b4   : > { %v973_v58 = vmul.f32 1.442695, %v913_v36  ;;  %v975_v59 = vmul.f32 1.442695, %v914_v38  ;;  %1012 = vadd.xlane.f32.xlu0 %v1011_v55  ;;  %v1014_v60 = vadd.f32 %v2307_v56, %v2301_v20  ;;  %v915_v11 = vsub.f32 %v2201_v42, %v884_v27  ;;  %v2361_v42 = vpop.f32.mrb[22].mxu0 }
 0x2b5   : > { %v916_v30 = vsub.f32 %v2205_v44, %v884_v27  ;;  %v2363_v44 = vpop.f32.mrb[23].mxu0 }
 0x2b6   : > { %1746 = vpow2.f32 %v973_v58  ;;  %1015 = vadd.xlane.f32.xlu1 %v1014_v60  ;;  %v977_v32 = vmul.f32 1.442695, %v915_v11 }
 0x2b7   : > { %1748 = vpow2.f32 %v975_v59  ;;  %v979_v37 = vmul.f32 1.442695, %v916_v30 }
 0x2b8   : > { %v2311_v61 = vpop.eup %1738  ;;  %1750 = vpow2.f32 %v977_v32 }
 0x2b9   : > { %v2313_v62 = vpop.eup %1740  ;;  %1752 = vpow2.f32 %v979_v37 }
 0x2ba   : > { %v2315_v40 = vpop.eup %1742  ;;  %v1017_v41 = vadd.f32 %v2313_v62, %v2311_v61 }
 0x2bb   : > { %v2319_v63 = vpop.eup %1744 }
 0x2bc   : > { %1018 = vadd.xlane.f32.xlu0 %v1017_v41  ;;  %v1020_v22 = vadd.f32 %v2319_v63, %v2315_v40 }
 0x2be   : > { %1021 = vadd.xlane.f32.xlu1 %v1020_v22 }
 0x2c0   : > { %v2323_v1 = vpop.eup %1746 }
 0x2c1   : > { %v2325_v8 = vpop.eup %1748 }
 0x2c2   : > { %v1023_v24 = vadd.f32 %v2325_v8, %v2323_v1  ;;  %v2352_v43 = vpop.eup %1750 }
 0x2c3   : > { %v2354_v46 = vpop.eup %1752 }
 0x2c4   : > { %1024 = vadd.xlane.f32.xlu0 %v1023_v24  ;;  %v1026_v47 = vadd.f32 %v2354_v46, %v2352_v43 }
 0x2cf   : > { %1108 = vperm.xlu1 %1671, %v1098_v26  }
 0x2d3   : > { %1113 = vperm.xlu1 %1671, %v1099_v19  }
 0x2da   : > { %1103 = vperm.xlu0 %1670, %v1097_v28  }
 0x2f7   : > { %1027 = vadd.xlane.f32.xlu1 %v1026_v47 }
 0x308   : > { %1118 = vperm.xlu1 %1671, %v1100_v48  }
 0x319   : > { %v983_v49 = vpop.xlane.xlu0 %982 }
 0x31a   : > { %1754 = vrcp.f32 %v983_v49 }
 0x31d   : > { %v986_v51 = vpop.xlane.xlu1 %985 }
 0x31e   : > { %1756 = vrcp.f32 %v986_v51 }
 0x321   : > { %v989_v34 = vpop.xlane.xlu0 %988 }
 0x322   : > { %1758 = vrcp.f32 %v989_v34 }
 0x324   : > { %v1755_v16 = vpop.eup %1754 }
 0x325   : > { %v992_v18 = vpop.xlane.xlu1 %991  ;;  %v1062_v36 = vmul.f32 %v1755_v16, %v2219_v6  ;;  %v1061_v38 = vmul.f32 %v1755_v16, %v2217_v0 }
 0x326   : > { %1760 = vrcp.f32 %v992_v18 }
 0x327   : > { %1278 = vst [vmem:[%s2371_s26 + $0x8] sm:$0xff] %v1062_v36  ;;  %1277 = vst [vmem:[%s2371_s26] sm:$0xff] %v1061_v38 }
 0x328   : > { %v1757_v55 = vpop.eup %1756 }
 0x329   : > { %v995_v58 = vpop.xlane.xlu0 %994  ;;  %v1064_v59 = vmul.f32 %v1757_v55, %v2229_v25  ;;  %v1063_v60 = vmul.f32 %v1757_v55, %v2225_v14 }
 0x32a   : > { %1762 = vrcp.f32 %v995_v58 }
 0x32b   : > { %v1195_v6 = vpack.c.bf16 %v1064_v59, %v1062_v36  ;;  %1280 = vst [vmem:[%s2371_s26 + $0x18] sm:$0xff] %v1064_v59  ;;  %v1194_v0 = vpack.c.bf16 %v1063_v60, %v1061_v38  ;;  %1279 = vst [vmem:[%s2371_s26 + $0x10] sm:$0xff] %v1063_v60 }
 0x32c   : > { %v1759_v41 = vpop.eup %1758  ;;  %v998_v22 = vpop.xlane.xlu1 %997 }
 0x32d   : > { %1764 = vrcp.f32 %v998_v22  ;;  %1210 = vmatprep.subr.bf16.mxu1 %v1195_v6  ;;  %v1066_v24 = vmul.f32 %v1759_v41, %v2235_v33  ;;  %v1065_v26 = vmul.f32 %v1759_v41, %v2233_v31 }
 0x32e   : > { %1211 = vmatpush1.bf16.xpose.msra.mxu1 %v1194_v0 }
 0x32f   : > { %1282 = vst [vmem:[%s2371_s26 + $0x28] sm:$0xff] %v1066_v24  ;;  %1281 = vst [vmem:[%s2371_s26 + $0x20] sm:$0xff] %v1065_v26 }
 0x330   : > { %v1761_v25 = vpop.eup %1760 }
 0x331   : > { %v1001_v14 = vpop.xlane.xlu0 %1000  ;;  %v1068_v19 = vmul.f32 %v1761_v25, %v2245_v50  ;;  %v1067_v28 = vmul.f32 %v1761_v25, %v2241_v45 }
 0x332   : > { %1766 = vrcp.f32 %v1001_v14 }
 0x333   : > { %v1197_v27 = vpack.c.bf16 %v1068_v19, %v1066_v24  ;;  %1284 = vst [vmem:[%s2371_s26 + $0x38] sm:$0xff] %v1068_v19  ;;  %v1196_v11 = vpack.c.bf16 %v1067_v28, %v1065_v26  ;;  %1283 = vst [vmem:[%s2371_s26 + $0x30] sm:$0xff] %v1067_v28 }
 0x334   : > { %v1763_v33 = vpop.eup %1762  ;;  %v1004_v31 = vpop.xlane.xlu1 %1003 }
 0x335   : > { %1768 = vrcp.f32 %v1004_v31  ;;  %1212 = vmatprep.subr.bf16.mxu1 %v1197_v27  ;;  %v1070_v30 = vmul.f32 %v1763_v33, %v2251_v53  ;;  %v1069_v32 = vmul.f32 %v1763_v33, %v2249_v52 }
 0x336   : > { %1213 = vmatpush1.bf16.xpose.msra.mxu1 %v1196_v11 }
 0x337   : > { %v1765_v50 = vpop.eup %1764  ;;  %1286 = vst [vmem:[%s2371_s26 + $0x48] sm:$0xff] %v1070_v30  ;;  %1285 = vst [vmem:[%s2371_s26 + $0x40] sm:$0xff] %v1069_v32 }
 0x338   : > { %v1072_v45 = vmul.f32 %v1765_v50, %v2259_v57  ;;  %v1071_v37 = vmul.f32 %v1765_v50, %v2253_v54 }
 0x339   : > { %v1007_v47 = vpop.xlane.xlu0 %1006 }
 0x33a   : > { %1770 = vrcp.f32 %v1007_v47  ;;  %v1199_v48 = vpack.c.bf16 %v1072_v45, %v1070_v30  ;;  %1288 = vst [vmem:[%s2371_s26 + $0x58] sm:$0xff] %v1072_v45  ;;  %1287 = vst [vmem:[%s2371_s26 + $0x50] sm:$0xff] %v1071_v37  ;;  %v1198_v53 = vpack.c.bf16 %v1071_v37, %v1069_v32 }
 0x33c   : > { %v1767_v49 = vpop.eup %1766  ;;  %1214 = vmatprep.subr.bf16.mxu1 %v1199_v48  ;;  %v1010_v52 = vpop.xlane.xlu1 %1009 }
 0x33d   : > { %1772 = vrcp.f32 %v1010_v52  ;;  %v1074_v51 = vmul.f32 %v1767_v49, %v2267_v2  ;;  %v1073_v57 = vmul.f32 %v1767_v49, %v2265_v23 }
 0x33e   : > { %1215 = vmatpush1.bf16.xpose.msra.mxu1 %v1198_v53 }
 0x33f   : > { %v1769_v34 = vpop.eup %1768  ;;  %1290 = vst [vmem:[%s2371_s26 + $0x68] sm:$0xff] %v1074_v51  ;;  %1289 = vst [vmem:[%s2371_s26 + $0x60] sm:$0xff] %v1073_v57 }
 0x340   : > { %v1076_v54 = vmul.f32 %v1769_v34, %v2275_v12  ;;  %v1075_v16 = vmul.f32 %v1769_v34, %v2269_v3 }
 0x341   : > { %v1013_v18 = vpop.xlane.xlu0 %1012 }
 0x342   : > { %1774 = vrcp.f32 %v1013_v18  ;;  %v1201_v36 = vpack.c.bf16 %v1076_v54, %v1074_v51  ;;  %1292 = vst [vmem:[%s2371_s26 + $0x78] sm:$0xff] %v1076_v54  ;;  %1291 = vst [vmem:[%s2371_s26 + $0x70] sm:$0xff] %v1075_v16  ;;  %v1200_v2 = vpack.c.bf16 %v1075_v16, %v1073_v57 }
 0x343   : > { %v1016_v23 = vpop.xlane.xlu1 %1015 }
 0x344   : > { %v1771_v38 = vpop.eup %1770  ;;  %1216 = vmatprep.subr.bf16.mxu1 %v1201_v36  ;;  %1776 = vrcp.f32 %v1016_v23 }
 0x345   : > { %v1078_v55 = vmul.f32 %v1771_v38, %v2283_v10  ;;  %v1077_v12 = vmul.f32 %v1771_v38, %v2281_v29 }
 0x346   : > { %1217 = vmatpush1.bf16.xpose.msra.mxu1 %v1200_v2 }
 0x347   : > { %v1773_v58 = vpop.eup %1772  ;;  %1294 = vst [vmem:[%s2371_s26 + $0x88] sm:$0xff] %v1078_v55  ;;  %1293 = vst [vmem:[%s2371_s26 + $0x80] sm:$0xff] %v1077_v12 }
 0x348   : > { %v1080_v3 = vmul.f32 %v1773_v58, %v2291_v39  ;;  %v1079_v59 = vmul.f32 %v1773_v58, %v2285_v13 }
 0x349   : > { %v1019_v60 = vpop.xlane.xlu0 %1018 }
 0x34a   : > { %1778 = vrcp.f32 %v1019_v60  ;;  %v1203_v6 = vpack.c.bf16 %v1080_v3, %v1078_v55  ;;  %1296 = vst [vmem:[%s2371_s26 + $0x98] sm:$0xff] %v1080_v3  ;;  %1295 = vst [vmem:[%s2371_s26 + $0x90] sm:$0xff] %v1079_v59  ;;  %v1202_v29 = vpack.c.bf16 %v1079_v59, %v1077_v12 }
 0x34b   : > { %v1022_v0 = vpop.xlane.xlu1 %1021 }
 0x34c   : > { %v1775_v10 = vpop.eup %1774  ;;  %1218 = vmatprep.subr.bf16.mxu1 %v1203_v6  ;;  %1780 = vrcp.f32 %v1022_v0 }
 0x34d   : > { %v1082_v41 = vmul.f32 %v1775_v10, %v2299_v17  ;;  %v1081_v39 = vmul.f32 %v1775_v10, %v2297_v35 }
 0x34e   : > { %1219 = vmatpush1.bf16.xpose.msra.mxu1 %v1202_v29  ;;  %v1777_v22 = vpop.eup %1776 }
 0x34f   : > { %1298 = vst [vmem:[%s2371_s26 + $0xa8] sm:$0xff] %v1082_v41  ;;  %1297 = vst [vmem:[%s2371_s26 + $0xa0] sm:$0xff] %v1081_v39  ;;  %v1084_v13 = vmul.f32 %v1777_v22, %v2307_v56  ;;  %v1083_v24 = vmul.f32 %v1777_v22, %v2301_v20  ;;  %v1109_v56 = vpop.permute.xlu1 %1108 }
 0x350   : > { %v1176_v31 = vadd.f32 %v2336_v7, %v1109_v56 }
 0x351   : > { %v1025_v26 = vpop.xlane.xlu0 %1024  ;;  %v1205_v25 = vpack.c.bf16 %v1084_v13, %v1082_v41  ;;  %1300 = vst [vmem:[%s2371_s26 + $0xb8] sm:$0xff] %v1084_v13  ;;  %1299 = vst [vmem:[%s2371_s26 + $0xb0] sm:$0xff] %v1083_v24  ;;  %v1204_v35 = vpack.c.bf16 %v1083_v24, %v1081_v39 }
 0x352   : > { %1782 = vrcp.f32 %v1025_v26 }
 0x353   : > { %1220 = vmatprep.subr.bf16.mxu1 %v1205_v25  ;;  %v1114_v7 = vpop.permute.xlu1 %1113 }
 0x354   : > { %v1779_v17 = vpop.eup %1778  ;;  %v1184_v47 = vadd.f32 %v2345_v9, %v1114_v7 }
 0x355   : > { %v1086_v14 = vmul.f32 %v1779_v17, %v2313_v62  ;;  %v1085_v19 = vmul.f32 %v1779_v17, %v2311_v61  ;;  %v1178_v62 = vadd.f32 %v2338_v15, %v1109_v56 }
 0x356   : > { %v1781_v28 = vpop.eup %1780  ;;  %1221 = vmatpush1.bf16.xpose.msra.mxu1 %v1204_v35 }
 0x357   : > { %v1088_v20 = vmul.f32 %v1781_v28, %v2319_v63  ;;  %1302 = vst [vmem:[%s2371_s26 + $0xc8] sm:$0xff] %v1086_v14  ;;  %v1087_v27 = vmul.f32 %v1781_v28, %v2315_v40  ;;  %1301 = vst [vmem:[%s2371_s26 + $0xc0] sm:$0xff] %v1085_v19 }
 0x359   : > { %v1104_v11 = vpop.permute.xlu0 %1103  ;;  %v1207_v33 = vpack.c.bf16 %v1088_v20, %v1086_v14  ;;  %1304 = vst [vmem:[%s2371_s26 + $0xd8] sm:$0xff] %v1088_v20  ;;  %1303 = vst [vmem:[%s2371_s26 + $0xd0] sm:$0xff] %v1087_v27  ;;  %v1206_v40 = vpack.c.bf16 %v1087_v27, %v1085_v19 }
 0x35a   : > { %v1172_v61 = vadd.f32 %v2332_v4, %v1104_v11  ;;  %v1174_v30 = vadd.f32 %v2334_v5, %v1104_v11  ;;  %v1182_v5 = vadd.f32 %v2343_v21, %v1114_v7 }
 0x35b   : > { %1222 = vmatprep.subr.bf16.mxu1 %v1207_v33 }
 0x35c   : > { %v1783_v63 = vpop.eup %1782  ;;  %v1190_v32 = vpack.c.bf16 %v1176_v31, %v1172_v61  ;;  %v1191_v50 = vpack.c.bf16 %v1178_v62, %v1174_v30 }
 0x35d   : > { %v1090_v45 = vmul.f32 %v1783_v63, %v2325_v8  ;;  %v1089_v37 = vmul.f32 %v1783_v63, %v2323_v1 }
 0x35e   : > { %1223 = vmatpush1.bf16.xpose.msra.mxu1 %v1206_v40  ;;  %1242 = vmatprep.mubr.bf16.mxu1 %v1191_v50 }
 0x35f   : > { %1306 = vst [vmem:[%s2371_s26 + $0xe8] sm:$0xff] %v1090_v45  ;;  %1305 = vst [vmem:[%s2371_s26 + $0xe0] sm:$0xff] %v1089_v37 }
 0x384   : > { %v1028_v15 = vpop.xlane.xlu1 %1027 }
 0x385   : > { %1784 = vrcp.f32 %v1028_v15 }
 0x388   : > { %v1119_v4 = vpop.permute.xlu1 %1118 }
 0x389   : > { %v1186_v48 = vadd.f32 %v2361_v42, %v1119_v4  ;;  %v1188_v8 = vadd.f32 %v2363_v44, %v1119_v4 }
 0x38b   : > { %v1192_v1 = vpack.c.bf16 %v1186_v48, %v1182_v5  ;;  %v1193_v49 = vpack.c.bf16 %v1188_v8, %v1184_v47 }
 0x38f   : > { %v1785_v52 = vpop.eup %1784 }
 0x390   : > { %v1092_v53 = vmul.f32 %v1785_v52, %v2354_v46  ;;  %v1091_v51 = vmul.f32 %v1785_v52, %v2352_v43 }
 0x392   : > { %v1209_v57 = vpack.c.bf16 %v1092_v53, %v1090_v45  ;;  %1308 = vst [vmem:[%s2371_s26 + $0xf8] sm:$0xff] %v1092_v53  ;;  %v1208_v21 = vpack.c.bf16 %v1091_v51, %v1089_v37  ;;  %1307 = vst [vmem:[%s2371_s26 + $0xf0] sm:$0xff] %v1091_v51  ;;  %s1792_s26 = scalar_lea.vmem %s1791_s27, 8192 }
 0x393   : > { %p1794_p7 = scmp.lt.s32.totalorder %s1792_s26, %s1786_s0 }
 0x394   : > { %1224 = vmatprep.subr.bf16.mxu1 %v1209_v57 }
 0x395   : > { %1225 = vmatpush1.bf16.xpose.msra.mxu1 %v1208_v21  ;;  %p1795_p10 = por %p1794_p7, %p1793_p6 }
 0x397   : > { %p1796_p11 = pnand %p1795_p10, %p1789_p5 }
 0x39c   : > { %1243 = vmatmul.mubr.bf16.vlgmr.msra.gmra.mrb[32].mxu1 %v1190_v32 }
 0x39d   : > { %1250 = vmatprep.mubr.bf16.mxu1 %v1193_v49 }
 0x3a4   : > { %1251 = vmatmul.mubr.bf16.gmra.mrb[36].mxu1 %v1192_v1 }
 0x3a5   : > { %1799 = shalt.err (!%p1796_p11)
}
 0x3a6   : > { %s1800_s23 = scalar_lea.hbm %s2449_s7, 4096  ;;  %s1804_s1 = scalar_lea.hbm %s2551_s9, 16384 }
 0x3a7   : > { %p1801_p12 = scmp.ne.s32.totalorder %s2449_s7, %s1800_s23  ;;  %p1805_p1 = scmp.lt.u32.totalorder %s2449_s7, %s2551_s9 }
 0x3a8   : > { %p1806_p2 = scmp.lt.u32.totalorder %s1804_s1, %s1800_s23  ;;  %p1808_p4 = scmp.lt.u32.totalorder %s1800_s23, %s2449_s7 }
 0x3a9   : > { %p1802_p13 = pnand %p1801_p12, %p2034_p8 }
 0x3aa   : > { %p1807_p3 = por %p1806_p2, %p1805_p1 }
 0x3ab   : > { %p1803_p0 = pneg %p1802_p13 }
 0x3ac   : > { %p1809_p5 = por %p1808_p4, %p1807_p3 }
 0x3ae   : > { %p1810_p6 = pnand %p1809_p5, %p1803_p0 }
 0x3b0   : > { %1813 = shalt.err (!%p1810_p6)
}
 0x3b1   : > { %s1916_s0 = smov 256   ;;  %s1917_s27 = smov 16  }
 0x3b2   : > { %1590 = dma.vmem_to_hbm [thread:$0]  (%p2034_p8), %s2451_s28, 4096, %s2449_s7, %s1315_s22, %s1916_s0, %s1916_s0, %s1917_s27  }
 0x3b3   : > { %s1259_s26 = sld [smem:[#allocation2]]  ;;  %s1504_s21 = sshll.u32 %s2366_s19, 5 }
 0x3b4   : > { %s398_s23 = scalar_lea.vmem [#allocation3], %s1504_s21  ;;  %s1549_s20 = sshll.u32 %s1900_s15, 3 }
 0x3b5   : > { %v1265_v46 = vld [vmem:[%s398_s23] sm:$0xff]  ;;  %v1266_v54 = vld [vmem:[%s398_s23 + $0x8] sm:$0xff]  ;;  %s442_s1 = scalar_lea.vmem [#allocation4], %s1504_s21  ;;  %s1326_s28 = sadd.s32 %s1896_s14, %s1549_s20  ;;  %v1267_v2 = vld [vmem:[%s398_s23 + $0x10] sm:$0xff] }
 0x3b6   : > { %s1329_s7 = sshll.u32 %s442_s1, 4  ;;  %v1268_v3 = vld [vmem:[%s398_s23 + $0x18] sm:$0xff]  ;;  %s1550_s22 = sshll.u32 %s1326_s28, 7  ;;  %s2482_s7 = int_to_ptr.vmem [resolvable:$true] %s1329_s7 }
 0x3b7   : > { %s2487_s30 = scalar_lea.hbm %s2550_s8, %s1550_s22  ;;  %s1310_s10 = scalar_lea.sflag [#allocation5], %s2366_s19 }
 0x3b8   : > { %s1814_s27 = scalar_lea.vmem %s2482_s7, 512 }
 0x3b9   : > { %v1260_v9 = vstv %s1259_s26  ;;  %p1815_p7 = scmp.ne.s32.totalorder %s2482_s7, %s1814_s27  ;;  %s1918_s26 = smov [#allocation4]  }
 0x3ba   : > { %s1818_s21 = sshll.u32 %s1918_s26, 4  ;;  %s1819_s21 = int_to_ptr.vmem [resolvable:$false] %s1818_s21 }
 0x3bb   : > { %p1816_p10 = pnand %p1815_p7, %p2034_p8  ;;  %s1820_s23 = scalar_lea.vmem %s1819_s21, 1024 }
 0x3bc   : > { %p1821_p12 = scmp.lt.s32.totalorder %s2482_s7, %s1819_s21  ;;  %p1822_p13 = scmp.lt.s32.totalorder %s1820_s23, %s1814_s27 }
 0x3bd   : > { %p1817_p11 = pneg %p1816_p10 }
 0x3be   : > { %p1823_p0 = por %p1822_p13, %p1821_p12 }
 0x3c0   : > { %p1824_p1 = pnand %p1823_p0, %p1817_p11 }
 0x46f   : > { %v1244_v43 = vpop.f32.mrb[32].mxu1 }
 0x470   : > { %v1261_v42 = vmul.f32 %v1260_v9, %v1244_v43  ;;  %v1246_v44 = vpop.f32.mrb[33].mxu1 }
 0x471   : > { %v1247_v34 = vpop.f32.mrb[34].mxu1 }
 0x472   : > { %v1269_v16 = vadd.f32 %v1265_v46, %v1261_v42  ;;  %v1262_v18 = vmul.f32 %v1260_v9, %v1247_v34  ;;  %v1249_v36 = vpop.f32.mrb[35].mxu1 }
 0x474   : > { %1273 = vst [vmem:[%s442_s1] sm:$0xff] %v1269_v16  ;;  %v1270_v38 = vadd.f32 %v1266_v54, %v1262_v18 }
 0x476   : > { %1274 = vst [vmem:[%s442_s1 + $0x8] sm:$0xff] %v1270_v38 }
 0x477   : > { %v1252_v23 = vpop.f32.mrb[36].mxu1 }
 0x478   : > { %v1263_v55 = vmul.f32 %v1260_v9, %v1252_v23  ;;  %v1254_v12 = vpop.f32.mrb[37].mxu1 }
 0x479   : > { %v1255_v58 = vpop.f32.mrb[38].mxu1 }
 0x47a   : > { %v1271_v59 = vadd.f32 %v1267_v2, %v1263_v55  ;;  %v1264_v60 = vmul.f32 %v1260_v9, %v1255_v58  ;;  %v1257_v6 = vpop.f32.mrb[39].mxu1 }
 0x47c   : > { %1275 = vst [vmem:[%s442_s1 + $0x10] sm:$0xff] %v1271_v59  ;;  %v1272_v0 = vadd.f32 %v1268_v3, %v1264_v60 }
 0x47e   : > { %1276 = vst [vmem:[%s442_s1 + $0x18] sm:$0xff] %v1272_v0 }
 0x47f   : > { %1827 = shalt.err (!%p1824_p1)
}
 0x480   : > { %s1828_s20 = scalar_lea.hbm %s2487_s30, 512  ;;  %s1832_s22 = scalar_lea.hbm %s2550_s8, 2048 }
 0x481   : > { %p1829_p2 = scmp.ne.s32.totalorder %s2487_s30, %s1828_s20  ;;  %p1833_p5 = scmp.lt.u32.totalorder %s2487_s30, %s2550_s8 }
 0x482   : > { %p1834_p6 = scmp.lt.u32.totalorder %s1832_s22, %s1828_s20  ;;  %p1836_p10 = scmp.lt.u32.totalorder %s1828_s20, %s2487_s30 }
 0x483   : > { %p1830_p3 = pnand %p1829_p2, %p2034_p8 }
 0x484   : > { %p1835_p7 = por %p1834_p6, %p1833_p5 }
 0x485   : > { %p1831_p4 = pneg %p1830_p3 }
 0x486   : > { %p1837_p11 = por %p1836_p10, %p1835_p7 }
 0x488   : > { %p1838_p12 = pnand %p1837_p11, %p1831_p4 }
 0x48a   : > { %1841 = shalt.err (!%p1838_p12)
}
 0x48b   : > { %s1919_s27 = smov 128   ;;  %s1920_s26 = smov 8  }
 0x48c   : > { %1589 = dma.vmem_to_hbm [thread:$0]  (%p2034_p8), %s2482_s7, 512, %s2487_s30, %s1310_s10, %s1919_s27, %s1916_s0, %s1920_s26  }
 0x48d PF: > { %p1600_p13 = scmp.ge.s32.totalorder %s1912_s18, 2  ;;  %s1363_s21 = sand.u32 1, %s1884_s11  }
 0x48e   : > { %s1364_s23 = scalar_lea.sflag [#allocation5], %s1363_s21 }
 0x48f   : > { %p1594_p0 = pnand %p1600_p13, %p2038_p9 }
 0x491   : > { %1875 = dma.done.wait (!%p1594_p0), %s1364_s23, 512  }
 0x492   : > { %1877 = vsyncadd (!%p1594_p0), %s1364_s23, 4294966784  ;;  %s1373_s20 = scalar_lea.sflag [#allocation7], %s1363_s21 }
 0x493   : > { %1879 = dma.done.wait (!%p1594_p0), %s1373_s20, 4096  }
 0x494   : > { %1881 = vsyncadd (!%p1594_p0), %s1373_s20, 4294963200  ;;  %s27_s18 = sadd.s32 1, %s1912_s18   ;;  %s2563_s24 = sld [smem:[#allocation10_spill]] }
 0x495   : > { %p24_p1 = scmp.ge.s32.totalorder %s27_s18, 6   ;;  %s2564_s19 = sld [smem:[#allocation11_spill]] }
 0x496   : > { %s2565_s11 = smov %s1888_s12  ;;  %s2566_s12 = smov %s1892_s13 }
 0x497   : > { %s2567_s13 = smov %s2046_s29  ;;  %s2568_s14 = smov %s1904_s16 }
 0x498   : > { %s2569_s15 = smov %s1908_s17  ;;  %26 = sbr.rel (!%p24_p1) target bundleno = 11 (0xb), region = 153 }
 0x49a   : > { %s2570_s16 = smov %s2563_s24 }
 0x49b   : > { %s2571_s17 = smov %s2564_s19 }
 0x49f   :  { %1378 = vsyncpa [#allocation5], 1 }
 0x4a0   :  { %1380 = vsyncpa [#allocation5 + $0x1], 1 }
 0x4a1   :  { %1381 = vsyncpa [#allocation7], 1 }
 0x4a2   :  { %1383 = vsyncpa [#allocation7 + $0x1], 1 }

</bundles_post_ra>
